<compile_context>
chip_gen: v6e
topology: v6e:2x2x1
jax: 0.10.0
libtpu: 0.0.40
codegen_flags: <defaults>
</compile_context>

<pallas_src>
import functools
import math

import jax
import jax.numpy as jnp
from jax import lax
from jax.experimental import pallas as pl
from jax.experimental.pallas import tpu as pltpu


NEG_SLOPE = 0.01      # nn.LeakyReLU default
LN_EPS = 1e-5         # nn.LayerNorm default
OBS_DIM = 22
PROPRIO_IDX = tuple(range(0, 6)) + tuple(range(18, 22))   # obs[:, :6] ++ obs[:, -4:]
EXTERO_IDX = tuple(range(6, 18))                           # obs[:, 6:18]


def _leaky(v):
    # max-form LeakyReLU: mul + max (2 VALU ops/elem) instead of cmp + mul + select.
    return jnp.maximum(v, NEG_SLOPE * v)


def _branch(x, w1, b1, w2, b2, w3, b3, w4, b4, g, beta, hid_dtype):
    """One VectorEncoder forward (pure jnp; used both in-kernel and as reference).

    feats_model: Linear(22->256, zero-padded rows) -> LeakyReLU -> Linear(256,256)
                 -> LeakyReLU -> Linear(256, latent)
    head_model : LeakyReLU -> Linear(latent, latent) -> LayerNorm(latent) -> Tanh

    Weights are bf16 (MXU operands), accumulation is f32.  The wide (.., 256) hidden
    epilogues run in `hid_dtype` (bf16 on v6e/v7x, f32 on v5e); LayerNorm/tanh are f32.
    """
    acc = jnp.dot(x.astype(jnp.bfloat16), w1, preferred_element_type=jnp.float32)
    h = _leaky(acc.astype(hid_dtype) + b1.astype(hid_dtype))

    acc = jnp.dot(h.astype(jnp.bfloat16), w2, preferred_element_type=jnp.float32)
    h = _leaky(acc.astype(hid_dtype) + b2.astype(hid_dtype))

    feats = jnp.dot(h.astype(jnp.bfloat16), w3,
                    preferred_element_type=jnp.float32) + b3          # (.., latent) f32

    h = _leaky(feats)
    h = jnp.dot(h.astype(jnp.bfloat16), w4,
                preferred_element_type=jnp.float32) + b4              # (.., latent) f32

    # One-pass LayerNorm moments: var = E[x^2] - mu^2 (single pair of cross-lane sums).
    n = h.shape[-1]
    s = jnp.sum(h, axis=-1, keepdims=True)
    s2 = jnp.sum(h * h, axis=-1, keepdims=True)
    mu = s * (1.0 / n)
    var = jnp.maximum(s2 * (1.0 / n) - mu * mu, 0.0)
    h = (h - mu) * lax.rsqrt(var + LN_EPS)
    return jnp.tanh(h * g + beta)


def fused_encoder_kernel(x_ref,
                         pw1, pb1, pw2, pb2, pw3, pb3, pw4, pb4, pg, pbt,
                         ew1, eb1, ew2, eb2, ew3, eb3, ew4, eb4, eg, ebt,
                         out_ref, *, latent, hid_dtype):
    """Both VectorEncoder branches on one batch tile; writes each latent into its slice."""
    x = x_ref[...]                       # (TB, 22) bf16
    z_prop = _branch(x, pw1[...], pb1[...], pw2[...], pb2[...], pw3[...], pb3[...],
                     pw4[...], pb4[...], pg[...], pbt[...], hid_dtype)
    z_exte = _branch(x, ew1[...], eb1[...], ew2[...], eb2[...], ew3[...], eb3[...],
                     ew4[...], eb4[...], eg[...], ebt[...], hid_dtype)
    # Direct slice writes — no concatenated temporary.
    out_ref[:, :latent] = z_prop.astype(out_ref.dtype)
    out_ref[:, latent:] = z_exte.astype(out_ref.dtype)


def _param_args(p):
    return (p["w1"], p["b1"], p["w2"], p["b2"], p["w3"], p["b3"],
            p["w4"], p["b4"], p["ln_gamma"], p["ln_beta"])


def _round_up(x, m):
    return ((x + m - 1) // m) * m


def _device_kind():
    try:
        return jax.devices()[0].device_kind.lower()
    except Exception:
        return ""


def _hidden_dtype():
    """bf16 hidden epilogue only where the VPU supports bf16 (v6e / v7x)."""
    kind = _device_kind()
    if ("v6" in kind) or ("v7" in kind):
        return jnp.bfloat16
    return jnp.float32


def _choose_batch_tiling(B):
    """Returns (TB, Bp): TB = rows per grid step, Bp = padded batch (multiple of TB)."""
    kind = _device_kind()
    B8 = max(8, _round_up(B, 8))
    cap = 512  # per-tile activations at TB=512 are < 2 MiB: well inside scoped VMEM
    if ("v7" in kind) and B8 >= 16:
        # Guarantee >= 2 grid steps so both v7x TensorCores get work via "parallel".
        TB = min(cap, _round_up((B8 + 1) // 2, 8))
    else:
        TB = min(cap, B8)
    Bp = _round_up(B8, TB)
    return TB, Bp


def proprioceptive_encoder_forward(obs, proprio_params, extero_params):
    """obs: (B, 22) (dict / (B, T, 22) variants reduce to this), returns (B, 2*latent)."""
    if isinstance(obs, dict):
        obs = obs["vector"]
    if obs.ndim == 3:                      # take last timestep, as in the PyTorch module
        obs = obs[:, -1, :]

    latent = proprio_params["w4"].shape[1]
    hid = proprio_params["w2"].shape[0]
    hid_dtype = _hidden_dtype()

    obs = obs.astype(jnp.bfloat16)         # MXU operand dtype; halves per-tile obs DMA
    B = obs.shape[0]
    TB, Bp = _choose_batch_tiling(B)
    if Bp != B:
        obs = jnp.pad(obs, ((0, Bp - B), (0, 0)))

    args = (obs,) + _param_args(proprio_params) + _param_args(extero_params)

    obs_spec = pl.BlockSpec((TB, OBS_DIM), lambda i: (i, 0))
    out_spec = pl.BlockSpec((TB, 2 * latent), lambda i: (i, 0))
    # Constant index_map -> weights/biases stay resident in VMEM across batch tiles.
    param_specs = [pl.BlockSpec(a.shape, lambda i: (0, 0)) for a in args[1:]]

    per_row_mac = OBS_DIM * hid + hid * hid + hid * latent + latent * latent
    cost = pl.CostEstimate(
        flops=int(2 * 2 * per_row_mac * Bp),               # 2 flops/MAC, 2 branches
        transcendentals=int(2 * Bp * (latent + 1)),        # tanh + rsqrt per row/branch
        bytes_accessed=int(2 * 2 * per_row_mac             # bf16 weights, both branches
                           + 2 * 4 * (hid + hid + 4 * latent)   # f32 biases + LN affine
                           + Bp * OBS_DIM * 2 + Bp * 2 * latent * 4),
    )

    kernel = functools.partial(fused_encoder_kernel, latent=latent, hid_dtype=hid_dtype)
    out = pl.pallas_call(
        kernel,
        out_shape=jax.ShapeDtypeStruct((Bp, 2 * latent), jnp.float32),
        grid=(Bp // TB,),
        in_specs=[obs_spec] + param_specs,
        out_specs=out_spec,
        compiler_params=pltpu.CompilerParams(
            dimension_semantics=("parallel",)),
        cost_estimate=cost,
    )(*args)
    return out[:B]


# ----------------------------------------------------------------------------
# Parameter initialization (deterministic, PyTorch-Linear-style uniform init)
# ----------------------------------------------------------------------------
def _linear_uniform(key, fan_in, w_shape, b_shape):
    kw, kb = jax.random.split(key)
    bound = 1.0 / math.sqrt(fan_in)
    w = jax.random.uniform(kw, w_shape, jnp.float32, -bound, bound)
    b = jax.random.uniform(kb, b_shape, jnp.float32, -bound, bound)
    return w, b


def init_vector_encoder(key, obs_cols, latent_dim, layers_dim=(256, 256)):
    """obs_cols: the columns of the full 22-D obs this branch reads.
    w1 is zero-padded to (22, layers_dim[0]) so the kernel consumes the whole obs."""
    in_dim = len(obs_cols)
    k1, k2, k3, k4 = jax.random.split(key, 4)
    w1, b1 = _linear_uniform(k1, in_dim, (in_dim, layers_dim[0]), (1, layers_dim[0]))
    w2, b2 = _linear_uniform(k2, layers_dim[0], (layers_dim[0], layers_dim[1]), (1, layers_dim[1]))
    w3, b3 = _linear_uniform(k3, layers_dim[1], (layers_dim[1], latent_dim), (1, latent_dim))
    w4, b4 = _linear_uniform(k4, latent_dim, (latent_dim, latent_dim), (1, latent_dim))

    w1_pad = jnp.zeros((OBS_DIM, layers_dim[0]), jnp.float32)
    w1_pad = w1_pad.at[jnp.asarray(obs_cols), :].set(w1)

    return {
        "w1": w1_pad.astype(jnp.bfloat16), "b1": b1,
        "w2": w2.astype(jnp.bfloat16),     "b2": b2,
        "w3": w3.astype(jnp.bfloat16),     "b3": b3,
        "w4": w4.astype(jnp.bfloat16),     "b4": b4,
        "ln_gamma": jnp.ones((1, latent_dim), jnp.float32),
        "ln_beta": jnp.zeros((1, latent_dim), jnp.float32),
    }


# ----------------------------------------------------------------------------
# Pure-JAX reference (same bf16-weight / same-epilogue numerics) for correctness check
# ----------------------------------------------------------------------------
def _ref_forward(obs, pp, ep):
    hid_dtype = _hidden_dtype()
    x = obs.astype(jnp.bfloat16)
    z_p = _branch(x, pp["w1"], pp["b1"], pp["w2"], pp["b2"], pp["w3"], pp["b3"],
                  pp["w4"], pp["b4"], pp["ln_gamma"], pp["ln_beta"], hid_dtype)
    z_e = _branch(x, ep["w1"], ep["b1"], ep["w2"], ep["b2"], ep["w3"], ep["b3"],
                  ep["w4"], ep["b4"], ep["ln_gamma"], ep["ln_beta"], hid_dtype)
    return jnp.concatenate([z_p, z_e], axis=1)


if __name__ == "__main__":
    B = 8
    LATENT = 32
    LAYERS = (256, 256)

    key = jax.random.PRNGKey(0)
    k_obs, k_prop, k_exte = jax.random.split(key, 3)

    obs = jax.random.normal(k_obs, (B, OBS_DIM), jnp.float32)
    proprio_params = init_vector_encoder(k_prop, PROPRIO_IDX, LATENT, LAYERS)
    extero_params = init_vector_encoder(k_exte, EXTERO_IDX, LATENT, LAYERS)

    fwd = jax.jit(proprioceptive_encoder_forward)
    z = jax.block_until_ready(fwd(obs, proprio_params, extero_params))

    z_ref = _ref_forward(obs, proprio_params, extero_params)
    assert z.shape == (B, 2 * LATENT), z.shape
    max_err = float(jnp.max(jnp.abs(z - z_ref)))
    assert jnp.allclose(z, z_ref, rtol=1e-3, atol=1e-3), f"mismatch vs reference: {max_err}"

    print("KERNEL_OK")
</pallas_src>

<mosaic_0001>
module attributes {stable_mosaic.version = 11 : i64} {
  func.func @fused_encoder_kernel(%arg0: i32, %arg1: memref<8x22xbf16, #tpu.memory_space<vmem>>, %arg2: memref<22x256xbf16, #tpu.memory_space<vmem>>, %arg3: memref<1x256xf32, #tpu.memory_space<vmem>>, %arg4: memref<256x256xbf16, #tpu.memory_space<vmem>>, %arg5: memref<1x256xf32, #tpu.memory_space<vmem>>, %arg6: memref<256x32xbf16, #tpu.memory_space<vmem>>, %arg7: memref<1x32xf32, #tpu.memory_space<vmem>>, %arg8: memref<32x32xbf16, #tpu.memory_space<vmem>>, %arg9: memref<1x32xf32, #tpu.memory_space<vmem>>, %arg10: memref<1x32xf32, #tpu.memory_space<vmem>>, %arg11: memref<1x32xf32, #tpu.memory_space<vmem>>, %arg12: memref<22x256xbf16, #tpu.memory_space<vmem>>, %arg13: memref<1x256xf32, #tpu.memory_space<vmem>>, %arg14: memref<256x256xbf16, #tpu.memory_space<vmem>>, %arg15: memref<1x256xf32, #tpu.memory_space<vmem>>, %arg16: memref<256x32xbf16, #tpu.memory_space<vmem>>, %arg17: memref<1x32xf32, #tpu.memory_space<vmem>>, %arg18: memref<32x32xbf16, #tpu.memory_space<vmem>>, %arg19: memref<1x32xf32, #tpu.memory_space<vmem>>, %arg20: memref<1x32xf32, #tpu.memory_space<vmem>>, %arg21: memref<1x32xf32, #tpu.memory_space<vmem>>, %arg22: memref<8x64xf32, #tpu.memory_space<vmem>>) attributes {dimension_semantics = [#tpu.dimension_semantics<parallel>], iteration_bounds = array<i64: 1>, scalar_prefetch = 0 : i64, scratch_operands = 0 : i64, tpu.core_type = #tpu.core_type<tc>, window_params = [{transform_indices = @transform_0, window_bounds = array<i64: 8, 22>}, {pipeline_mode = #tpu.pipeline_mode<synchronous>, transform_indices = @transform_1, window_bounds = array<i64: 22, 256>}, {pipeline_mode = #tpu.pipeline_mode<synchronous>, transform_indices = @transform_2, window_bounds = array<i64: 1, 256>}, {pipeline_mode = #tpu.pipeline_mode<synchronous>, transform_indices = @transform_3, window_bounds = array<i64: 256, 256>}, {pipeline_mode = #tpu.pipeline_mode<synchronous>, transform_indices = @transform_4, window_bounds = array<i64: 1, 256>}, {pipeline_mode = #tpu.pipeline_mode<synchronous>, transform_indices = @transform_5, window_bounds = array<i64: 256, 32>}, {pipeline_mode = #tpu.pipeline_mode<synchronous>, transform_indices = @transform_6, window_bounds = array<i64: 1, 32>}, {pipeline_mode = #tpu.pipeline_mode<synchronous>, transform_indices = @transform_7, window_bounds = array<i64: 32, 32>}, {pipeline_mode = #tpu.pipeline_mode<synchronous>, transform_indices = @transform_8, window_bounds = array<i64: 1, 32>}, {pipeline_mode = #tpu.pipeline_mode<synchronous>, transform_indices = @transform_9, window_bounds = array<i64: 1, 32>}, {pipeline_mode = #tpu.pipeline_mode<synchronous>, transform_indices = @transform_10, window_bounds = array<i64: 1, 32>}, {pipeline_mode = #tpu.pipeline_mode<synchronous>, transform_indices = @transform_11, window_bounds = array<i64: 22, 256>}, {pipeline_mode = #tpu.pipeline_mode<synchronous>, transform_indices = @transform_12, window_bounds = array<i64: 1, 256>}, {pipeline_mode = #tpu.pipeline_mode<synchronous>, transform_indices = @transform_13, window_bounds = array<i64: 256, 256>}, {pipeline_mode = #tpu.pipeline_mode<synchronous>, transform_indices = @transform_14, window_bounds = array<i64: 1, 256>}, {pipeline_mode = #tpu.pipeline_mode<synchronous>, transform_indices = @transform_15, window_bounds = array<i64: 256, 32>}, {pipeline_mode = #tpu.pipeline_mode<synchronous>, transform_indices = @transform_16, window_bounds = array<i64: 1, 32>}, {pipeline_mode = #tpu.pipeline_mode<synchronous>, transform_indices = @transform_17, window_bounds = array<i64: 32, 32>}, {pipeline_mode = #tpu.pipeline_mode<synchronous>, transform_indices = @transform_18, window_bounds = array<i64: 1, 32>}, {pipeline_mode = #tpu.pipeline_mode<synchronous>, transform_indices = @transform_19, window_bounds = array<i64: 1, 32>}, {pipeline_mode = #tpu.pipeline_mode<synchronous>, transform_indices = @transform_20, window_bounds = array<i64: 1, 32>}, {transform_indices = @transform_21, window_bounds = array<i64: 8, 64>}]} {
    %c0 = arith.constant 0 : index
    %c0_0 = arith.constant 0 : index
    %0 = vector.load %arg1[%c0, %c0_0] : memref<8x22xbf16, #tpu.memory_space<vmem>>, vector<8x22xbf16>
    %c0_1 = arith.constant 0 : index
    %c0_2 = arith.constant 0 : index
    %1 = vector.load %arg2[%c0_1, %c0_2] : memref<22x256xbf16, #tpu.memory_space<vmem>>, vector<22x256xbf16>
    %c0_3 = arith.constant 0 : index
    %c0_4 = arith.constant 0 : index
    %2 = vector.load %arg3[%c0_3, %c0_4] : memref<1x256xf32, #tpu.memory_space<vmem>>, vector<1x256xf32>
    %c0_5 = arith.constant 0 : index
    %c0_6 = arith.constant 0 : index
    %3 = vector.load %arg4[%c0_5, %c0_6] : memref<256x256xbf16, #tpu.memory_space<vmem>>, vector<256x256xbf16>
    %c0_7 = arith.constant 0 : index
    %c0_8 = arith.constant 0 : index
    %4 = vector.load %arg5[%c0_7, %c0_8] : memref<1x256xf32, #tpu.memory_space<vmem>>, vector<1x256xf32>
    %c0_9 = arith.constant 0 : index
    %c0_10 = arith.constant 0 : index
    %5 = vector.load %arg6[%c0_9, %c0_10] : memref<256x32xbf16, #tpu.memory_space<vmem>>, vector<256x32xbf16>
    %c0_11 = arith.constant 0 : index
    %c0_12 = arith.constant 0 : index
    %6 = vector.load %arg7[%c0_11, %c0_12] : memref<1x32xf32, #tpu.memory_space<vmem>>, vector<1x32xf32>
    %c0_13 = arith.constant 0 : index
    %c0_14 = arith.constant 0 : index
    %7 = vector.load %arg8[%c0_13, %c0_14] : memref<32x32xbf16, #tpu.memory_space<vmem>>, vector<32x32xbf16>
    %c0_15 = arith.constant 0 : index
    %c0_16 = arith.constant 0 : index
    %8 = vector.load %arg9[%c0_15, %c0_16] : memref<1x32xf32, #tpu.memory_space<vmem>>, vector<1x32xf32>
    %c0_17 = arith.constant 0 : index
    %c0_18 = arith.constant 0 : index
    %9 = vector.load %arg10[%c0_17, %c0_18] : memref<1x32xf32, #tpu.memory_space<vmem>>, vector<1x32xf32>
    %c0_19 = arith.constant 0 : index
    %c0_20 = arith.constant 0 : index
    %10 = vector.load %arg11[%c0_19, %c0_20] : memref<1x32xf32, #tpu.memory_space<vmem>>, vector<1x32xf32>
    %cst = arith.constant dense<0.000000e+00> : vector<8x256xf32>
    %11 = tpu.matmul %0, %1, %cst {dimension_numbers = #tpu.dot_dimension_numbers<[1], [0], [0], [1], [0, 0, 1, 1], [], []>} : vector<8x22xbf16>, vector<22x256xbf16>, vector<8x256xf32> -> vector<8x256xf32>
    %12 = vector.broadcast %2 : vector<1x256xf32> to vector<8x256xf32>
    %13 = arith.addf %11, %12 : vector<8x256xf32>
    %cst_21 = arith.constant 0.00999999977 : f32
    %14 = vector.broadcast %cst_21 : f32 to vector<8x256xf32>
    %15 = arith.mulf %14, %13 : vector<8x256xf32>
    %16 = arith.maximumf %13, %15 : vector<8x256xf32>
    %17 = arith.truncf %16 : vector<8x256xf32> to vector<8x256xbf16>
    %cst_22 = arith.constant dense<0.000000e+00> : vector<8x256xf32>
    %18 = tpu.matmul %17, %3, %cst_22 {dimension_numbers = #tpu.dot_dimension_numbers<[1], [0], [0], [1], [0, 0, 1, 1], [], []>} : vector<8x256xbf16>, vector<256x256xbf16>, vector<8x256xf32> -> vector<8x256xf32>
    %19 = vector.broadcast %4 : vector<1x256xf32> to vector<8x256xf32>
    %20 = arith.addf %18, %19 : vector<8x256xf32>
    %cst_23 = arith.constant 0.00999999977 : f32
    %21 = vector.broadcast %cst_23 : f32 to vector<8x256xf32>
    %22 = arith.mulf %21, %20 : vector<8x256xf32>
    %23 = arith.maximumf %20, %22 : vector<8x256xf32>
    %24 = arith.truncf %23 : vector<8x256xf32> to vector<8x256xbf16>
    %cst_24 = arith.constant dense<0.000000e+00> : vector<8x32xf32>
    %25 = tpu.matmul %24, %5, %cst_24 {dimension_numbers = #tpu.dot_dimension_numbers<[1], [0], [0], [1], [0, 0, 1, 1], [], []>} : vector<8x256xbf16>, vector<256x32xbf16>, vector<8x32xf32> -> vector<8x32xf32>
    %26 = vector.broadcast %6 : vector<1x32xf32> to vector<8x32xf32>
    %27 = arith.addf %25, %26 : vector<8x32xf32>
    %cst_25 = arith.constant 0.00999999977 : f32
    %28 = vector.broadcast %cst_25 : f32 to vector<8x32xf32>
    %29 = arith.mulf %28, %27 : vector<8x32xf32>
    %30 = arith.maximumf %27, %29 : vector<8x32xf32>
    %31 = arith.truncf %30 : vector<8x32xf32> to vector<8x32xbf16>
    %cst_26 = arith.constant dense<0.000000e+00> : vector<8x32xf32>
    %32 = tpu.matmul %31, %7, %cst_26 {dimension_numbers = #tpu.dot_dimension_numbers<[1], [0], [0], [1], [0, 0, 1, 1], [], []>} : vector<8x32xbf16>, vector<32x32xbf16>, vector<8x32xf32> -> vector<8x32xf32>
    %33 = vector.broadcast %8 : vector<1x32xf32> to vector<8x32xf32>
    %34 = arith.addf %32, %33 : vector<8x32xf32>
    %cst_27 = arith.constant dense<0.000000e+00> : vector<8xf32>
    %35 = vector.multi_reduction <add>, %34, %cst_27 [1] : vector<8x32xf32> to vector<8xf32>
    %36 = vector.shape_cast %35 : vector<8xf32> to vector<8x1xf32>
    %37 = arith.mulf %34, %34 : vector<8x32xf32>
    %cst_28 = arith.constant dense<0.000000e+00> : vector<8xf32>
    %38 = vector.multi_reduction <add>, %37, %cst_28 [1] : vector<8x32xf32> to vector<8xf32>
    %39 = vector.shape_cast %38 : vector<8xf32> to vector<8x1xf32>
    %cst_29 = arith.constant 3.125000e-02 : f32
    %40 = vector.broadcast %cst_29 : f32 to vector<8x1xf32>
    %41 = arith.mulf %36, %40 : vector<8x1xf32>
    %cst_30 = arith.constant 3.125000e-02 : f32
    %42 = vector.broadcast %cst_30 : f32 to vector<8x1xf32>
    %43 = arith.mulf %39, %42 : vector<8x1xf32>
    %44 = arith.mulf %41, %41 : vector<8x1xf32>
    %45 = arith.subf %43, %44 : vector<8x1xf32>
    %cst_31 = arith.constant 0.000000e+00 : f32
    %46 = vector.broadcast %cst_31 : f32 to vector<8x1xf32>
    %47 = arith.maximumf %45, %46 : vector<8x1xf32>
    %48 = vector.broadcast %41 : vector<8x1xf32> to vector<8x32xf32>
    %49 = arith.subf %34, %48 : vector<8x32xf32>
    %cst_32 = arith.constant 9.99999974E-6 : f32
    %50 = vector.broadcast %cst_32 : f32 to vector<8x1xf32>
    %51 = arith.addf %47, %50 : vector<8x1xf32>
    %52 = math.rsqrt %51 : vector<8x1xf32>
    %53 = vector.broadcast %52 : vector<8x1xf32> to vector<8x32xf32>
    %54 = arith.mulf %49, %53 : vector<8x32xf32>
    %55 = vector.broadcast %9 : vector<1x32xf32> to vector<8x32xf32>
    %56 = arith.mulf %54, %55 : vector<8x32xf32>
    %57 = vector.broadcast %10 : vector<1x32xf32> to vector<8x32xf32>
    %58 = arith.addf %56, %57 : vector<8x32xf32>
    %59 = math.tanh %58 : vector<8x32xf32>
    %c0_33 = arith.constant 0 : index
    %c0_34 = arith.constant 0 : index
    %60 = vector.load %arg12[%c0_33, %c0_34] : memref<22x256xbf16, #tpu.memory_space<vmem>>, vector<22x256xbf16>
    %c0_35 = arith.constant 0 : index
    %c0_36 = arith.constant 0 : index
    %61 = vector.load %arg13[%c0_35, %c0_36] : memref<1x256xf32, #tpu.memory_space<vmem>>, vector<1x256xf32>
    %c0_37 = arith.constant 0 : index
    %c0_38 = arith.constant 0 : index
    %62 = vector.load %arg14[%c0_37, %c0_38] : memref<256x256xbf16, #tpu.memory_space<vmem>>, vector<256x256xbf16>
    %c0_39 = arith.constant 0 : index
    %c0_40 = arith.constant 0 : index
    %63 = vector.load %arg15[%c0_39, %c0_40] : memref<1x256xf32, #tpu.memory_space<vmem>>, vector<1x256xf32>
    %c0_41 = arith.constant 0 : index
    %c0_42 = arith.constant 0 : index
    %64 = vector.load %arg16[%c0_41, %c0_42] : memref<256x32xbf16, #tpu.memory_space<vmem>>, vector<256x32xbf16>
    %c0_43 = arith.constant 0 : index
    %c0_44 = arith.constant 0 : index
    %65 = vector.load %arg17[%c0_43, %c0_44] : memref<1x32xf32, #tpu.memory_space<vmem>>, vector<1x32xf32>
    %c0_45 = arith.constant 0 : index
    %c0_46 = arith.constant 0 : index
    %66 = vector.load %arg18[%c0_45, %c0_46] : memref<32x32xbf16, #tpu.memory_space<vmem>>, vector<32x32xbf16>
    %c0_47 = arith.constant 0 : index
    %c0_48 = arith.constant 0 : index
    %67 = vector.load %arg19[%c0_47, %c0_48] : memref<1x32xf32, #tpu.memory_space<vmem>>, vector<1x32xf32>
    %c0_49 = arith.constant 0 : index
    %c0_50 = arith.constant 0 : index
    %68 = vector.load %arg20[%c0_49, %c0_50] : memref<1x32xf32, #tpu.memory_space<vmem>>, vector<1x32xf32>
    %c0_51 = arith.constant 0 : index
    %c0_52 = arith.constant 0 : index
    %69 = vector.load %arg21[%c0_51, %c0_52] : memref<1x32xf32, #tpu.memory_space<vmem>>, vector<1x32xf32>
    %cst_53 = arith.constant dense<0.000000e+00> : vector<8x256xf32>
    %70 = tpu.matmul %0, %60, %cst_53 {dimension_numbers = #tpu.dot_dimension_numbers<[1], [0], [0], [1], [0, 0, 1, 1], [], []>} : vector<8x22xbf16>, vector<22x256xbf16>, vector<8x256xf32> -> vector<8x256xf32>
    %71 = vector.broadcast %61 : vector<1x256xf32> to vector<8x256xf32>
    %72 = arith.addf %70, %71 : vector<8x256xf32>
    %cst_54 = arith.constant 0.00999999977 : f32
    %73 = vector.broadcast %cst_54 : f32 to vector<8x256xf32>
    %74 = arith.mulf %73, %72 : vector<8x256xf32>
    %75 = arith.maximumf %72, %74 : vector<8x256xf32>
    %76 = arith.truncf %75 : vector<8x256xf32> to vector<8x256xbf16>
    %cst_55 = arith.constant dense<0.000000e+00> : vector<8x256xf32>
    %77 = tpu.matmul %76, %62, %cst_55 {dimension_numbers = #tpu.dot_dimension_numbers<[1], [0], [0], [1], [0, 0, 1, 1], [], []>} : vector<8x256xbf16>, vector<256x256xbf16>, vector<8x256xf32> -> vector<8x256xf32>
    %78 = vector.broadcast %63 : vector<1x256xf32> to vector<8x256xf32>
    %79 = arith.addf %77, %78 : vector<8x256xf32>
    %cst_56 = arith.constant 0.00999999977 : f32
    %80 = vector.broadcast %cst_56 : f32 to vector<8x256xf32>
    %81 = arith.mulf %80, %79 : vector<8x256xf32>
    %82 = arith.maximumf %79, %81 : vector<8x256xf32>
    %83 = arith.truncf %82 : vector<8x256xf32> to vector<8x256xbf16>
    %cst_57 = arith.constant dense<0.000000e+00> : vector<8x32xf32>
    %84 = tpu.matmul %83, %64, %cst_57 {dimension_numbers = #tpu.dot_dimension_numbers<[1], [0], [0], [1], [0, 0, 1, 1], [], []>} : vector<8x256xbf16>, vector<256x32xbf16>, vector<8x32xf32> -> vector<8x32xf32>
    %85 = vector.broadcast %65 : vector<1x32xf32> to vector<8x32xf32>
    %86 = arith.addf %84, %85 : vector<8x32xf32>
    %cst_58 = arith.constant 0.00999999977 : f32
    %87 = vector.broadcast %cst_58 : f32 to vector<8x32xf32>
    %88 = arith.mulf %87, %86 : vector<8x32xf32>
    %89 = arith.maximumf %86, %88 : vector<8x32xf32>
    %90 = arith.truncf %89 : vector<8x32xf32> to vector<8x32xbf16>
    %cst_59 = arith.constant dense<0.000000e+00> : vector<8x32xf32>
    %91 = tpu.matmul %90, %66, %cst_59 {dimension_numbers = #tpu.dot_dimension_numbers<[1], [0], [0], [1], [0, 0, 1, 1], [], []>} : vector<8x32xbf16>, vector<32x32xbf16>, vector<8x32xf32> -> vector<8x32xf32>
    %92 = vector.broadcast %67 : vector<1x32xf32> to vector<8x32xf32>
    %93 = arith.addf %91, %92 : vector<8x32xf32>
    %cst_60 = arith.constant dense<0.000000e+00> : vector<8xf32>
    %94 = vector.multi_reduction <add>, %93, %cst_60 [1] : vector<8x32xf32> to vector<8xf32>
    %95 = vector.shape_cast %94 : vector<8xf32> to vector<8x1xf32>
    %96 = arith.mulf %93, %93 : vector<8x32xf32>
    %cst_61 = arith.constant dense<0.000000e+00> : vector<8xf32>
    %97 = vector.multi_reduction <add>, %96, %cst_61 [1] : vector<8x32xf32> to vector<8xf32>
    %98 = vector.shape_cast %97 : vector<8xf32> to vector<8x1xf32>
    %cst_62 = arith.constant 3.125000e-02 : f32
    %99 = vector.broadcast %cst_62 : f32 to vector<8x1xf32>
    %100 = arith.mulf %95, %99 : vector<8x1xf32>
    %cst_63 = arith.constant 3.125000e-02 : f32
    %101 = vector.broadcast %cst_63 : f32 to vector<8x1xf32>
    %102 = arith.mulf %98, %101 : vector<8x1xf32>
    %103 = arith.mulf %100, %100 : vector<8x1xf32>
    %104 = arith.subf %102, %103 : vector<8x1xf32>
    %cst_64 = arith.constant 0.000000e+00 : f32
    %105 = vector.broadcast %cst_64 : f32 to vector<8x1xf32>
    %106 = arith.maximumf %104, %105 : vector<8x1xf32>
    %107 = vector.broadcast %100 : vector<8x1xf32> to vector<8x32xf32>
    %108 = arith.subf %93, %107 : vector<8x32xf32>
    %cst_65 = arith.constant 9.99999974E-6 : f32
    %109 = vector.broadcast %cst_65 : f32 to vector<8x1xf32>
    %110 = arith.addf %106, %109 : vector<8x1xf32>
    %111 = math.rsqrt %110 : vector<8x1xf32>
    %112 = vector.broadcast %111 : vector<8x1xf32> to vector<8x32xf32>
    %113 = arith.mulf %108, %112 : vector<8x32xf32>
    %114 = vector.broadcast %68 : vector<1x32xf32> to vector<8x32xf32>
    %115 = arith.mulf %113, %114 : vector<8x32xf32>
    %116 = vector.broadcast %69 : vector<1x32xf32> to vector<8x32xf32>
    %117 = arith.addf %115, %116 : vector<8x32xf32>
    %118 = math.tanh %117 : vector<8x32xf32>
    %c0_66 = arith.constant 0 : index
    %c0_67 = arith.constant 0 : index
    %119 = vector.load %arg22[%c0_66, %c0_67] : memref<8x64xf32, #tpu.memory_space<vmem>>, vector<8x32xf32>
    tpu.vector_store %arg22[%c0_66, %c0_67], %59 {strides = array<i32>} : memref<8x64xf32, #tpu.memory_space<vmem>>, vector<8x32xf32>,
    %c0_68 = arith.constant 0 : index
    %c32 = arith.constant 32 : index
    %120 = vector.load %arg22[%c0_68, %c32] : memref<8x64xf32, #tpu.memory_space<vmem>>, vector<8x32xf32>
    tpu.vector_store %arg22[%c0_68, %c32], %118 {strides = array<i32>} : memref<8x64xf32, #tpu.memory_space<vmem>>, vector<8x32xf32>,
    return
  }
  func.func @transform_0(%arg0: i32) -> (i32, i32) {
    %c0_i32 = arith.constant 0 : i32
    %c0_i32_0 = arith.constant 0 : i32
    return %arg0, %c0_i32 : i32, i32
  }
  func.func @transform_1(%arg0: i32) -> (i32, i32) {
    %c0_i32 = arith.constant 0 : i32
    %c0_i32_0 = arith.constant 0 : i32
    %c0_i32_1 = arith.constant 0 : i32
    return %c0_i32, %c0_i32_0 : i32, i32
  }
  func.func @transform_2(%arg0: i32) -> (i32, i32) {
    %c0_i32 = arith.constant 0 : i32
    %c0_i32_0 = arith.constant 0 : i32
    %c0_i32_1 = arith.constant 0 : i32
    return %c0_i32, %c0_i32_0 : i32, i32
  }
  func.func @transform_3(%arg0: i32) -> (i32, i32) {
    %c0_i32 = arith.constant 0 : i32
    %c0_i32_0 = arith.constant 0 : i32
    %c0_i32_1 = arith.constant 0 : i32
    return %c0_i32, %c0_i32_0 : i32, i32
  }
  func.func @transform_4(%arg0: i32) -> (i32, i32) {
    %c0_i32 = arith.constant 0 : i32
    %c0_i32_0 = arith.constant 0 : i32
    %c0_i32_1 = arith.constant 0 : i32
    return %c0_i32, %c0_i32_0 : i32, i32
  }
  func.func @transform_5(%arg0: i32) -> (i32, i32) {
    %c0_i32 = arith.constant 0 : i32
    %c0_i32_0 = arith.constant 0 : i32
    %c0_i32_1 = arith.constant 0 : i32
    return %c0_i32, %c0_i32_0 : i32, i32
  }
  func.func @transform_6(%arg0: i32) -> (i32, i32) {
    %c0_i32 = arith.constant 0 : i32
    %c0_i32_0 = arith.constant 0 : i32
    %c0_i32_1 = arith.constant 0 : i32
    return %c0_i32, %c0_i32_0 : i32, i32
  }
  func.func @transform_7(%arg0: i32) -> (i32, i32) {
    %c0_i32 = arith.constant 0 : i32
    %c0_i32_0 = arith.constant 0 : i32
    %c0_i32_1 = arith.constant 0 : i32
    return %c0_i32, %c0_i32_0 : i32, i32
  }
  func.func @transform_8(%arg0: i32) -> (i32, i32) {
    %c0_i32 = arith.constant 0 : i32
    %c0_i32_0 = arith.constant 0 : i32
    %c0_i32_1 = arith.constant 0 : i32
    return %c0_i32, %c0_i32_0 : i32, i32
  }
  func.func @transform_9(%arg0: i32) -> (i32, i32) {
    %c0_i32 = arith.constant 0 : i32
    %c0_i32_0 = arith.constant 0 : i32
    %c0_i32_1 = arith.constant 0 : i32
    return %c0_i32, %c0_i32_0 : i32, i32
  }
  func.func @transform_10(%arg0: i32) -> (i32, i32) {
    %c0_i32 = arith.constant 0 : i32
    %c0_i32_0 = arith.constant 0 : i32
    %c0_i32_1 = arith.constant 0 : i32
    return %c0_i32, %c0_i32_0 : i32, i32
  }
  func.func @transform_11(%arg0: i32) -> (i32, i32) {
    %c0_i32 = arith.constant 0 : i32
    %c0_i32_0 = arith.constant 0 : i32
    %c0_i32_1 = arith.constant 0 : i32
    return %c0_i32, %c0_i32_0 : i32, i32
  }
  func.func @transform_12(%arg0: i32) -> (i32, i32) {
    %c0_i32 = arith.constant 0 : i32
    %c0_i32_0 = arith.constant 0 : i32
    %c0_i32_1 = arith.constant 0 : i32
    return %c0_i32, %c0_i32_0 : i32, i32
  }
  func.func @transform_13(%arg0: i32) -> (i32, i32) {
    %c0_i32 = arith.constant 0 : i32
    %c0_i32_0 = arith.constant 0 : i32
    %c0_i32_1 = arith.constant 0 : i32
    return %c0_i32, %c0_i32_0 : i32, i32
  }
  func.func @transform_14(%arg0: i32) -> (i32, i32) {
    %c0_i32 = arith.constant 0 : i32
    %c0_i32_0 = arith.constant 0 : i32
    %c0_i32_1 = arith.constant 0 : i32
    return %c0_i32, %c0_i32_0 : i32, i32
  }
  func.func @transform_15(%arg0: i32) -> (i32, i32) {
    %c0_i32 = arith.constant 0 : i32
    %c0_i32_0 = arith.constant 0 : i32
    %c0_i32_1 = arith.constant 0 : i32
    return %c0_i32, %c0_i32_0 : i32, i32
  }
  func.func @transform_16(%arg0: i32) -> (i32, i32) {
    %c0_i32 = arith.constant 0 : i32
    %c0_i32_0 = arith.constant 0 : i32
    %c0_i32_1 = arith.constant 0 : i32
    return %c0_i32, %c0_i32_0 : i32, i32
  }
  func.func @transform_17(%arg0: i32) -> (i32, i32) {
    %c0_i32 = arith.constant 0 : i32
    %c0_i32_0 = arith.constant 0 : i32
    %c0_i32_1 = arith.constant 0 : i32
    return %c0_i32, %c0_i32_0 : i32, i32
  }
  func.func @transform_18(%arg0: i32) -> (i32, i32) {
    %c0_i32 = arith.constant 0 : i32
    %c0_i32_0 = arith.constant 0 : i32
    %c0_i32_1 = arith.constant 0 : i32
    return %c0_i32, %c0_i32_0 : i32, i32
  }
  func.func @transform_19(%arg0: i32) -> (i32, i32) {
    %c0_i32 = arith.constant 0 : i32
    %c0_i32_0 = arith.constant 0 : i32
    %c0_i32_1 = arith.constant 0 : i32
    return %c0_i32, %c0_i32_0 : i32, i32
  }
  func.func @transform_20(%arg0: i32) -> (i32, i32) {
    %c0_i32 = arith.constant 0 : i32
    %c0_i32_0 = arith.constant 0 : i32
    %c0_i32_1 = arith.constant 0 : i32
    return %c0_i32, %c0_i32_0 : i32, i32
  }
  func.func @transform_21(%arg0: i32) -> (i32, i32) {
    %c0_i32 = arith.constant 0 : i32
    %c0_i32_0 = arith.constant 0 : i32
    return %arg0, %c0_i32 : i32, i32
  }
}

</mosaic_0001>

<bundles_post_ra>
// kernel: proprioceptive_encoder_forward.1
= control target key start
LH: loop header
LB: loop body
LE: loop exit
PB: predicated region body
PF: predicated region fallthrough
CT: control target
= control target key end

     0   :  { %s2475_s0 = inlined_call_operand.vmem [shape: bf16[8,22], index: 0, kind: input, shape index: {}]   ;;  %s2476_s1 = inlined_call_operand.vmem [shape: bf16[22,256], index: 1, kind: input, shape index: {}]   ;;  %s2477_s2 = inlined_call_operand.hbm [shape: f32[1,256], index: 2, kind: input, shape index: {}]   ;;  %s2478_s3 = inlined_call_operand.vmem [shape: bf16[256,256], index: 3, kind: input, shape index: {}]   ;;  %s2479_s4 = inlined_call_operand.hbm [shape: f32[1,256], index: 4, kind: input, shape index: {}]   ;;  %s2480_s5 = inlined_call_operand.vmem [shape: bf16[256,32], index: 5, kind: input, shape index: {}]   ;;  %s2481_s6 = inlined_call_operand.vmem [shape: f32[1,32], index: 6, kind: input, shape index: {}]   ;;  %s2482_s7 = inlined_call_operand.hbm [shape: bf16[32,32], index: 7, kind: input, shape index: {}]   ;;  %s2483_s8 = inlined_call_operand.hbm [shape: f32[1,32], index: 8, kind: input, shape index: {}]   ;;  %s2484_s9 = inlined_call_operand.hbm [shape: f32[1,32], index: 9, kind: input, shape index: {}]   ;;  %s2485_s10 = inlined_call_operand.hbm [shape: f32[1,32], index: 10, kind: input, shape index: {}]   ;;  %s2486_s11 = inlined_call_operand.vmem [shape: bf16[22,256], index: 11, kind: input, shape index: {}]   ;;  %s2487_s12 = inlined_call_operand.hbm [shape: f32[1,256], index: 12, kind: input, shape index: {}]   ;;  %s2488_s13 = inlined_call_operand.hbm [shape: bf16[256,256], index: 13, kind: input, shape index: {}]   ;;  %s2489_s14 = inlined_call_operand.hbm [shape: f32[1,256], index: 14, kind: input, shape index: {}]   ;;  %s2490_s15 = inlined_call_operand.vmem [shape: bf16[256,32], index: 15, kind: input, shape index: {}]   ;;  %s2491_s16 = inlined_call_operand.hbm [shape: f32[1,32], index: 16, kind: input, shape index: {}]   ;;  %s2492_s17 = inlined_call_operand.vmem [shape: bf16[32,32], index: 17, kind: input, shape index: {}]   ;;  %s2493_s18 = inlined_call_operand.vmem [shape: f32[1,32], index: 18, kind: input, shape index: {}]   ;;  %s2494_s19 = inlined_call_operand.vmem [shape: f32[1,32], index: 19, kind: input, shape index: {}]   ;;  %s2495_s20 = inlined_call_operand.vmem [shape: f32[1,32], index: 20, kind: input, shape index: {}]   ;;  %s2496_s21 = inlined_call_operand.hbm [shape: f32[8,64], index: 21, kind: output, shape index: {}]  }
   0x1   :  { %2500 = sst [smem:[#allocation27_spill]] %s2475_s0 }
   0x2   :  { %2501 = sst [smem:[#allocation28_spill]] %s2476_s1 }
   0x3   :  { %2502 = sst [smem:[#allocation29_spill]] %s2477_s2 }
   0x4   :  { %2503 = sst [smem:[#allocation30_spill]] %s2478_s3 }
   0x5   :  { %2504 = sst [smem:[#allocation31_spill]] %s2479_s4 }
   0x6   :  { %2505 = sst [smem:[#allocation32_spill]] %s2480_s5 }
   0x7   :  { %26 = vsyncpa [#allocation3], 0 }
   0x8   :  { %27 = vsyncpa [#allocation6], 0 }
   0x9   :  { %28 = vsyncpa [#allocation9], 0 }
   0xa   :  { %29 = vsyncpa [#allocation12], 0 }
   0xb   :  { %30 = vsyncpa [#allocation15], 0 }
   0xc   :  { %31 = vsyncpa [#allocation18], 0 }
   0xd   :  { %32 = vsyncpa [#allocation4], 0  ;;  %s2037_s2 = smov [#allocation5]   ;;  %s2038_s26 = smov [#allocation8]  }
   0xe   :  { %s55_s25 = sshll.u32 %s2037_s2, 4  ;;  %s81_s27 = sshll.u32 %s2038_s26, 4  ;;  %s56_s25 = int_to_ptr.vmem [resolvable:$true] %s55_s25  ;;  %s82_s27 = int_to_ptr.vmem [resolvable:$true] %s81_s27 }
   0xf   :  { %s1811_s3 = scalar_lea.vmem %s56_s25, 32  ;;  %p1816_p1 = scmp.lt.s32.totalorder %s56_s25, %s56_s25 }
  0x10   :  { %p1812_p0 = scmp.ne.s32.totalorder %s56_s25, %s1811_s3  ;;  %p1817_p2 = scmp.lt.s32.totalorder %s1811_s3, %s1811_s3 }
  0x12   :  { %p1818_p3 = por %p1817_p2, %p1816_p1 }
  0x14   :  { %p1819_p4 = pnand %p1818_p3, %p1812_p0 }
  0x16   :  { %1822 = shalt.err (!%p1819_p4)
}
  0x17   :  { %s2506_s0 = sld [smem:[#allocation31_spill]]  ;;  %s1831_s4 = scalar_lea.vmem %s82_s27, 16 }
  0x18   :  { %p1832_p5 = scmp.ne.s32.totalorder %s82_s27, %s1831_s4  ;;  %s1835_s30 = scalar_lea.vmem %s82_s27, 32 }
  0x19   :  { %p1836_p6 = scmp.lt.s32.totalorder %s82_s27, %s82_s27  ;;  %p1837_p7 = scmp.lt.s32.totalorder %s1835_s30, %s1831_s4 }
  0x1b   :  { %p1838_p8 = por %p1837_p7, %p1836_p6 }
  0x1d   :  { %58 = dma.hbm_to_vmem [thread:$0]  %s2506_s0, 32, %s56_s25, [#allocation6]  }
  0x1e   :  { %p1839_p9 = pnand %p1838_p8, %p1832_p5 }
  0x20   :  { %1842 = shalt.err (!%p1839_p9)
}
  0x21   :  { %84 = dma.hbm_to_vmem [thread:$0]  %s2483_s8, 16, %s82_s27, [#allocation9]  }
  0x22   :  { %s2039_s23 = smov [#allocation11]   ;;  %s2040_s24 = smov [#allocation14]  }
  0x23   :  { %s101_s1 = sshll.u32 %s2039_s23, 4  ;;  %s122_s2 = sshll.u32 %s2040_s24, 4  ;;  %s102_s1 = int_to_ptr.vmem [resolvable:$true] %s101_s1  ;;  %s123_s2 = int_to_ptr.vmem [resolvable:$true] %s122_s2 }
  0x24   :  { %s1851_s26 = scalar_lea.vmem %s102_s1, 16  ;;  %s1855_s25 = scalar_lea.vmem %s102_s1, 32 }
  0x25   :  { %p1852_p10 = scmp.ne.s32.totalorder %s102_s1, %s1851_s26  ;;  %p1856_p11 = scmp.lt.s32.totalorder %s102_s1, %s102_s1 }
  0x26   :  { %p1857_p12 = scmp.lt.s32.totalorder %s1855_s25, %s1851_s26 }
  0x28   :  { %p1858_p13 = por %p1857_p12, %p1856_p11 }
  0x2a   :  { %p1859_p0 = pnand %p1858_p13, %p1852_p10 }
  0x2c   :  { %1862 = shalt.err (!%p1859_p0)
}
  0x2d   :  { %104 = dma.hbm_to_vmem [thread:$0]  %s2485_s10, 16, %s102_s1, [#allocation12]  }
  0x2e   :  { %s1871_s29 = scalar_lea.vmem %s123_s2, 4096  ;;  %p1876_p2 = scmp.lt.s32.totalorder %s123_s2, %s123_s2 }
  0x2f   :  { %p1872_p1 = scmp.ne.s32.totalorder %s123_s2, %s1871_s29  ;;  %p1877_p3 = scmp.lt.s32.totalorder %s1871_s29, %s1871_s29 }
  0x31   :  { %p1878_p4 = por %p1877_p3, %p1876_p2 }
  0x33   :  { %p1879_p5 = pnand %p1878_p4, %p1872_p1 }
  0x35   :  { %1882 = shalt.err (!%p1879_p5)
}
  0x36   :  { %s2041_s8 = smov 128   ;;  %s2042_s27 = smov 8  }
  0x37   :  { %128 = dma.hbm_to_vmem [thread:$0]  %s2488_s13, 4096, %s123_s2, [#allocation15], %s2041_s8, %s2041_s8, %s2042_s27  }
  0x38   :  { %s2043_s30 = smov [#allocation2]   ;;  %s2044_s22 = smov [#allocation7]  }
  0x39   :  { %s43_s5 = sshll.u32 %s2043_s30, 4  ;;  %s68_s23 = sshll.u32 %s2044_s22, 4  ;;  %s44_s5 = int_to_ptr.vmem [resolvable:$true] %s43_s5  ;;  %s69_s23 = int_to_ptr.vmem [resolvable:$true] %s68_s23 }
  0x3a   :  { %s1891_s10 = scalar_lea.vmem %s44_s5, 32  ;;  %p1896_p7 = scmp.lt.s32.totalorder %s44_s5, %s44_s5 }
  0x3b   :  { %p1892_p6 = scmp.ne.s32.totalorder %s44_s5, %s1891_s10  ;;  %p1897_p8 = scmp.lt.s32.totalorder %s1891_s10, %s1891_s10 }
  0x3d   :  { %p1898_p9 = por %p1897_p8, %p1896_p7 }
  0x3f   :  { %p1899_p10 = pnand %p1898_p9, %p1892_p6 }
  0x41   :  { %1902 = shalt.err (!%p1899_p10)
}
  0x42   :  { %s2507_s26 = sld [smem:[#allocation29_spill]]  ;;  %s1911_s25 = scalar_lea.vmem %s69_s23, 256 }
  0x43   :  { %p1912_p11 = scmp.ne.s32.totalorder %s69_s23, %s1911_s25  ;;  %p1916_p12 = scmp.lt.s32.totalorder %s69_s23, %s69_s23 }
  0x44   :  { %p1917_p13 = scmp.lt.s32.totalorder %s1911_s25, %s1911_s25 }
  0x46   :  { %p1918_p0 = por %p1917_p13, %p1916_p12 }
  0x48   :  { %46 = dma.hbm_to_vmem [thread:$0]  %s2507_s26, 32, %s44_s5, [#allocation3]  }
  0x49   :  { %p1919_p1 = pnand %p1918_p0, %p1912_p11 }
  0x4b   :  { %1922 = shalt.err (!%p1919_p1)
}
  0x4c   :  { %s2045_s13 = smov 64   ;;  %s2046_s2 = smov 4  }
  0x4d   :  { %74 = dma.hbm_to_vmem [thread:$0]  %s2482_s7, 256, %s69_s23, [#allocation6], %s2045_s13, %s2045_s13, %s2046_s2  }
  0x4e   :  { %s2047_s29 = smov [#allocation10]   ;;  %s2048_s27 = smov [#allocation13]  }
  0x4f   :  { %s91_s8 = sshll.u32 %s2047_s29, 4  ;;  %s113_s0 = sshll.u32 %s2048_s27, 4  ;;  %s92_s8 = int_to_ptr.vmem [resolvable:$true] %s91_s8  ;;  %s114_s0 = int_to_ptr.vmem [resolvable:$true] %s113_s0 }
  0x50   :  { %s1931_s4 = scalar_lea.vmem %s92_s8, 16  ;;  %s1935_s30 = scalar_lea.vmem %s92_s8, 32 }
  0x51   :  { %p1932_p2 = scmp.ne.s32.totalorder %s92_s8, %s1931_s4  ;;  %p1936_p3 = scmp.lt.s32.totalorder %s92_s8, %s92_s8 }
  0x52   :  { %p1937_p4 = scmp.lt.s32.totalorder %s1935_s30, %s1931_s4 }
  0x54   :  { %p1938_p5 = por %p1937_p4, %p1936_p3 }
  0x56   :  { %p1939_p6 = pnand %p1938_p5, %p1932_p2 }
  0x58   :  { %1942 = shalt.err (!%p1939_p6)
}
  0x59   :  { %94 = dma.hbm_to_vmem [thread:$0]  %s2484_s9, 16, %s92_s8, [#allocation9]  }
  0x5a   :  { %s1951_s10 = scalar_lea.vmem %s114_s0, 32  ;;  %p1956_p8 = scmp.lt.s32.totalorder %s114_s0, %s114_s0 }
  0x5b   :  { %p1952_p7 = scmp.ne.s32.totalorder %s114_s0, %s1951_s10  ;;  %p1957_p9 = scmp.lt.s32.totalorder %s1951_s10, %s1951_s10 }
  0x5d   :  { %p1958_p10 = por %p1957_p9, %p1956_p8 }
  0x5f   :  { %p1959_p11 = pnand %p1958_p10, %p1952_p7 }
  0x61   :  { %1962 = shalt.err (!%p1959_p11)
}
  0x62   :  { %116 = dma.hbm_to_vmem [thread:$0]  %s2487_s12, 32, %s114_s0, [#allocation12]  }
  0x63   :  { %s2049_s1 = smov [#allocation16]   ;;  %s2050_s26 = smov [#allocation17]  }
  0x64   :  { %s135_s24 = sshll.u32 %s2049_s1, 4  ;;  %s147_s25 = sshll.u32 %s2050_s26, 4  ;;  %s136_s24 = int_to_ptr.vmem [resolvable:$true] %s135_s24  ;;  %s148_s25 = int_to_ptr.vmem [resolvable:$true] %s147_s25 }
  0x65   :  { %s1971_s13 = scalar_lea.vmem %s136_s24, 32  ;;  %p1976_p13 = scmp.lt.s32.totalorder %s136_s24, %s136_s24 }
  0x66   :  { %p1972_p12 = scmp.ne.s32.totalorder %s136_s24, %s1971_s13  ;;  %p1977_p0 = scmp.lt.s32.totalorder %s1971_s13, %s1971_s13 }
  0x68   :  { %p1978_p1 = por %p1977_p0, %p1976_p13 }
  0x6a   :  { %p1979_p2 = pnand %p1978_p1, %p1972_p12 }
  0x6c   :  { %1982 = shalt.err (!%p1979_p2)
}
  0x6d   :  { %138 = dma.hbm_to_vmem [thread:$0]  %s2489_s14, 32, %s136_s24, [#allocation15]  }
  0x6e   :  { %s1991_s3 = scalar_lea.vmem %s148_s25, 16  ;;  %s1995_s12 = scalar_lea.vmem %s148_s25, 32 }
  0x6f   :  { %p1992_p3 = scmp.ne.s32.totalorder %s148_s25, %s1991_s3  ;;  %p1996_p4 = scmp.lt.s32.totalorder %s148_s25, %s148_s25 }
  0x70   :  { %p1997_p5 = scmp.lt.s32.totalorder %s1995_s12, %s1991_s3 }
  0x72   :  { %p1998_p6 = por %p1997_p5, %p1996_p4 }
  0x74   :  { %p1999_p7 = pnand %p1998_p6, %p1992_p3 }
  0x76   :  { %2002 = shalt.err (!%p1999_p7)
}
  0x77   :  { %150 = dma.hbm_to_vmem [thread:$0]  %s2491_s16, 16, %s148_s25, [#allocation18]  }
  0x78   :  { %2023 = dma.done.wait [#allocation3], 32  }
  0x79   :  { %2024 = vsyncadd [#allocation3], 4294967264 }
  0x7a   :  { %2025 = dma.done.wait [#allocation6], 288  }
  0x7b   :  { %2026 = vsyncadd [#allocation6], 4294967008 }
  0x7c   :  { %2027 = dma.done.wait [#allocation9], 32  }
  0x7d   :  { %2028 = vsyncadd [#allocation9], 4294967264 }
  0x7e   :  { %2029 = dma.done.wait [#allocation12], 48  }
  0x7f   :  { %2030 = vsyncadd [#allocation12], 4294967248 }
  0x80   :  { %2031 = dma.done.wait [#allocation15], 4128  }
  0x81   :  { %2032 = vsyncadd [#allocation15], 4294963168 }
  0x82   :  { %2033 = dma.done.wait [#allocation18], 16  }
  0x83   :  { %2034 = vsyncadd [#allocation18], 4294967280  ;;  %v2051_v0 = vmov 0   ;;  %s2508_s27 = sld [smem:[#allocation28_spill]]  ;;  %vm298_vm0 = vcmask 1042432   ;;  %vm294_vm1 = vcmask 179200   ;;  %v269_v50 = vlaneseq }
  0x84   :  { %337 = vmatprep.mubr.bf16.mxu1 %v2051_v0  ;;  %s2509_s10 = sld [smem:[#allocation30_spill]]  ;;  %v194_v53 = vld [vmem:[#allocation2] sm:$0x3]  ;;  %vm2053_vm2 = vmmov 0   ;;  %vm733_vm3 = vcmask 261120   ;;  %s2054_s9 = smov 32  }
  0x85   :  { %s2510_s1 = sld [smem:[#allocation27_spill]]  ;;  %v270_v51 = vshrl.u32 %v269_v50, 7  ;;  %v1732_v50 = vld [vmem:[#allocation14 + $0x60] ss:$8 sps:$4 sm:$0xff]   ;;  %vm1424_vm4 = vcmask 523520  }
  0x86   :  { %s2511_s23 = sld [smem:[#allocation32_spill]] }
  0x87   :  { %v2341_v52 = vsub.s32 0, %v270_v51  ;;  %v2343_v54 = vsub.s32 1, %v270_v51  ;;  %v1737_v51 = vld [vmem:[#allocation14 + $0x54] ss:$8 sps:$4 sm:$0xff]  }
  0x89   :  { %v193_v1 = vld [vmem:[%s2508_s27 + $0x10] sm:$0x77]  ;;  %v1655_v4 = vld [vmem:[%s2508_s27 + $0x4] ss:$8 sps:$4 sm:$0xff]   ;;  %v1657_v6 = vld [vmem:[%s2508_s27] ss:$8 sps:$4 sm:$0xff]   ;;  %v272_v55 = vrot.slane %v194_v53, %v2341_v52  ;;  %v276_v56 = vrot.slane %v194_v53, %v2343_v54 }
  0x8a   :  { %v1449_v2 = vcombine.high %v193_v1, %v193_v1  ;;  %v1448_v3 = vcombine.low %v193_v1, %v193_v1  ;;  %v1660_v7 = vld [vmem:[%s2509_s10 + $0x74] ss:$8 sps:$4 sm:$0xff]   ;;  %v1658_v9 = vld [vmem:[%s2509_s10 + $0x70] ss:$8 sps:$4 sm:$0xff]   ;;  %v1663_v10 = vld [vmem:[%s2509_s10 + $0x64] ss:$8 sps:$4 sm:$0xff]  }
  0x8b   :  { %v2214_v8 = vld [vmem:[%s2510_s1] sm:$0xf]  ;;  %v1666_v12 = vld [vmem:[%s2509_s10 + $0x54] ss:$8 sps:$4 sm:$0xff]   ;;  %v1664_v13 = vld [vmem:[%s2509_s10 + $0x50] ss:$8 sps:$4 sm:$0xff]  }
  0x8c   :  { %1450 = vmatprep.subr.msk.bf16.mxu1 %vm298_vm0, %v1449_v2  ;;  %v300_v5 = vsel %vm298_vm0, %v1448_v3, 0  ;;  %v1661_v11 = vld [vmem:[%s2509_s10 + $0x60] ss:$8 sps:$4 sm:$0xff]   ;;  %v1669_v14 = vld [vmem:[%s2509_s10 + $0x44] ss:$8 sps:$4 sm:$0xff]   ;;  %v1706_v40 = vld [vmem:[%s2511_s23 + $0x78] sm:$0xff]  }
  0x8d   :  { %318 = vmatpush1.bf16.msra.mxu1 %v300_v5  ;;  %v1667_v15 = vld [vmem:[%s2509_s10 + $0x40] ss:$8 sps:$4 sm:$0xff]   ;;  %v1672_v16 = vld [vmem:[%s2509_s10 + $0x34] ss:$8 sps:$4 sm:$0xff]   ;;  %v1670_v17 = vld [vmem:[%s2509_s10 + $0x30] ss:$8 sps:$4 sm:$0xff]   ;;  %1568 = vmatprep.subr.bf16.mxu0 %v1706_v40 }
  0x8e   :  { %319 = vmatprep.subr.bf16.mxu1 %v1655_v4  ;;  %v1675_v18 = vld [vmem:[%s2509_s10 + $0x24] ss:$8 sps:$4 sm:$0xff]   ;;  %v1673_v19 = vld [vmem:[%s2509_s10 + $0x20] ss:$8 sps:$4 sm:$0xff]   ;;  %v1678_v20 = vld [vmem:[%s2509_s10 + $0x14] ss:$8 sps:$4 sm:$0xff]  }
  0x8f   :  { %v1676_v21 = vld [vmem:[%s2509_s10 + $0x10] ss:$8 sps:$4 sm:$0xff]   ;;  %v1681_v22 = vld [vmem:[%s2509_s10 + $0x4] ss:$8 sps:$4 sm:$0xff]   ;;  %v1679_v23 = vld [vmem:[%s2509_s10] ss:$8 sps:$4 sm:$0xff]  }
  0x90   :  { %v1684_v24 = vld [vmem:[%s2509_s10 + $0xf4] ss:$8 sps:$4 sm:$0xff]   ;;  %v1682_v25 = vld [vmem:[%s2509_s10 + $0xf0] ss:$8 sps:$4 sm:$0xff]   ;;  %v1687_v26 = vld [vmem:[%s2509_s10 + $0xe4] ss:$8 sps:$4 sm:$0xff]  }
  0x91   :  { %320 = vmatpush1.bf16.msra.mxu1 %v1657_v6  ;;  %v1685_v27 = vld [vmem:[%s2509_s10 + $0xe0] ss:$8 sps:$4 sm:$0xff]   ;;  %v1690_v28 = vld [vmem:[%s2509_s10 + $0xd4] ss:$8 sps:$4 sm:$0xff]   ;;  %v1688_v29 = vld [vmem:[%s2509_s10 + $0xd0] ss:$8 sps:$4 sm:$0xff]  }
  0x92   :  { %523 = vmatprep.subr.bf16.mxu1 %v1660_v7  ;;  %v1693_v30 = vld [vmem:[%s2509_s10 + $0xc4] ss:$8 sps:$4 sm:$0xff]   ;;  %v1691_v31 = vld [vmem:[%s2509_s10 + $0xc0] ss:$8 sps:$4 sm:$0xff]   ;;  %v1696_v32 = vld [vmem:[%s2509_s10 + $0xb4] ss:$8 sps:$4 sm:$0xff]  }
  0x93   :  { %v1694_v33 = vld [vmem:[%s2509_s10 + $0xb0] ss:$8 sps:$4 sm:$0xff]   ;;  %v1699_v34 = vld [vmem:[%s2509_s10 + $0xa4] ss:$8 sps:$4 sm:$0xff]   ;;  %v1697_v35 = vld [vmem:[%s2509_s10 + $0xa0] ss:$8 sps:$4 sm:$0xff]  }
  0x94   :  { %1451 = vmatmul.mubr.msk.bf16.vlgmr.msra.gmra.mxu1 %vm294_vm1, %v2214_v8  ;;  %v1702_v36 = vld [vmem:[%s2509_s10 + $0x94] ss:$8 sps:$4 sm:$0xff]   ;;  %v1700_v37 = vld [vmem:[%s2509_s10 + $0x90] ss:$8 sps:$4 sm:$0xff]   ;;  %v1705_v38 = vld [vmem:[%s2509_s10 + $0x84] ss:$8 sps:$4 sm:$0xff]  }
  0x95   :  { %524 = vmatpush1.bf16.msra.mxu1 %v1658_v9  ;;  %v1703_v39 = vld [vmem:[%s2509_s10 + $0x80] ss:$8 sps:$4 sm:$0xff]   ;;  %v1707_v41 = vld [vmem:[%s2511_s23 + $0x38] sm:$0xff]   ;;  %v1708_v42 = vld [vmem:[%s2511_s23 + $0x70] sm:$0xff]   ;;  %s2055_s10 = smov [#allocation19]  }
  0x96   :  { %525 = vmatprep.subr.bf16.mxu1 %v1663_v10  ;;  %1569 = vmatpush3.bf16.msra.mxu0 %v1707_v41  ;;  %v1709_v43 = vld [vmem:[%s2511_s23 + $0x30] sm:$0xff]   ;;  %v1710_v44 = vld [vmem:[%s2511_s23 + $0x68] sm:$0xff]   ;;  %v1712_v46 = vld [vmem:[%s2511_s23 + $0x60] sm:$0xff]   ;;  %s1432_s2 = sshll.u32 %s2055_s10, 4  ;;  %s1433_s2 = int_to_ptr.vmem [resolvable:$true] %s1432_s2 }
  0x97   :  { %1570 = vmatprep.subr.bf16.mxu0 %v1708_v42  ;;  %v1711_v45 = vld [vmem:[%s2511_s23 + $0x28] sm:$0xff]   ;;  %v1713_v47 = vld [vmem:[%s2511_s23 + $0x20] sm:$0xff]   ;;  %v1714_v48 = vld [vmem:[%s2511_s23 + $0x58] sm:$0xff]   ;;  %p2008_p9 = scmp.lt.s32.totalorder %s1433_s2, %s1433_s2 }
  0x98   :  { %v1715_v49 = vld [vmem:[%s2511_s23 + $0x18] sm:$0xff]   ;;  %v1716_v6 = vld [vmem:[%s2511_s23 + $0x50] sm:$0xff]   ;;  %v1718_v9 = vld [vmem:[%s2511_s23 + $0x48] sm:$0xff]  }
  0x99   :  { %526 = vmatpush1.bf16.msra.mxu1 %v1661_v11  ;;  %v1717_v7 = vld [vmem:[%s2511_s23 + $0x10] sm:$0xff]   ;;  %v1719_v10 = vld [vmem:[%s2511_s23 + $0x8] sm:$0xff]   ;;  %v1720_v11 = vld [vmem:[%s2511_s23 + $0x40] sm:$0xff]  }
  0x9a   :  { %527 = vmatprep.subr.bf16.mxu1 %v1666_v12  ;;  %1571 = vmatpush3.bf16.msra.mxu0 %v1709_v43  ;;  %v1721_v12 = vld [vmem:[%s2511_s23] sm:$0xff]   ;;  %v1735_v53 = vld [vmem:[#allocation14 + $0x50] ss:$8 sps:$4 sm:$0xff]   ;;  %s2003_s23 = scalar_lea.vmem %s1433_s2, 128 }
  0x9b   :  { %1572 = vmatprep.subr.bf16.mxu0 %v1710_v44  ;;  %p2004_p8 = scmp.ne.s32.totalorder %s1433_s2, %s2003_s23  ;;  %p2009_p10 = scmp.lt.s32.totalorder %s2003_s23, %s2003_s23 }
  0x9d   :  { %528 = vmatpush1.bf16.msra.mxu1 %v1664_v13  ;;  %v227_v13 = vld [vmem:[#allocation5] sm:$0x3]  ;;  %p2010_p11 = por %p2009_p10, %p2008_p9 }
  0x9e   :  { %529 = vmatprep.subr.bf16.mxu1 %v1669_v14  ;;  %1573 = vmatpush3.bf16.msra.mxu0 %v1711_v45  ;;  %v356_v14 = vrot.slane %v227_v13, %v2341_v52  ;;  %v1728_v45 = vld [vmem:[%s2486_s11 + $0x4] ss:$8 sps:$4 sm:$0xff]  }
  0x9f   :  { %1574 = vmatprep.subr.bf16.mxu0 %v1712_v46  ;;  %v1726_v46 = vld [vmem:[%s2486_s11] ss:$8 sps:$4 sm:$0xff]   ;;  %p2011_p12 = pnand %p2010_p11, %p2004_p8 }
  0xa1   :  { %530 = vmatpush1.bf16.msra.mxu1 %v1667_v15  ;;  %v360_v15 = vrot.slane %v227_v13, %v2343_v54  ;;  %v1773_v13 = vld [vmem:[#allocation14 + $0x94] ss:$8 sps:$4 sm:$0xff]  }
  0xa2   :  { %531 = vmatprep.subr.bf16.mxu1 %v1672_v16  ;;  %1575 = vmatpush3.bf16.msra.mxu0 %v1713_v47  ;;  %v1731_v47 = vld [vmem:[#allocation14 + $0x74] ss:$8 sps:$4 sm:$0xff]  }
  0xa3   :  { %1576 = vmatprep.subr.bf16.mxu0 %v1714_v48  ;;  %v1729_v48 = vld [vmem:[#allocation14 + $0x70] ss:$8 sps:$4 sm:$0xff]  }
  0xa5   :  { %532 = vmatpush1.bf16.msra.mxu1 %v1670_v17 }
  0xa6   :  { %533 = vmatprep.subr.bf16.mxu1 %v1675_v18  ;;  %1577 = vmatpush3.bf16.msra.mxu0 %v1715_v49  ;;  %v1734_v49 = vld [vmem:[#allocation14 + $0x64] ss:$8 sps:$4 sm:$0xff]  }
  0xa7   :  { %1578 = vmatprep.subr.bf16.mxu0 %v1716_v6  ;;  %v1764_v6 = vld [vmem:[#allocation14 + $0xc4] ss:$8 sps:$4 sm:$0xff]  }
  0xa9   :  { %534 = vmatpush1.bf16.msra.mxu1 %v1673_v19 }
  0xaa   :  { %535 = vmatprep.subr.bf16.mxu1 %v1678_v20  ;;  %1579 = vmatpush3.bf16.msra.mxu0 %v1717_v7  ;;  %v1762_v7 = vld [vmem:[#allocation14 + $0xc0] ss:$8 sps:$4 sm:$0xff]  }
  0xab   :  { %1580 = vmatprep.subr.bf16.mxu0 %v1718_v9  ;;  %v1765_v9 = vld [vmem:[#allocation14 + $0xb0] ss:$8 sps:$4 sm:$0xff]  }
  0xad   :  { %536 = vmatpush1.bf16.msra.mxu1 %v1676_v21 }
  0xae   :  { %537 = vmatprep.subr.bf16.mxu1 %v1681_v22  ;;  %1581 = vmatpush3.bf16.msra.mxu0 %v1719_v10  ;;  %v1767_v10 = vld [vmem:[#allocation14 + $0xb4] ss:$8 sps:$4 sm:$0xff]  }
  0xaf   :  { %1582 = vmatprep.subr.bf16.mxu0 %v1720_v11  ;;  %v1768_v11 = vld [vmem:[#allocation14 + $0xa0] ss:$8 sps:$4 sm:$0xff]  }
  0xb1   :  { %538 = vmatpush1.bf16.msra.mxu1 %v1679_v23 }
  0xb2   :  { %539 = vmatprep.subr.bf16.mxu1 %v1684_v24  ;;  %1583 = vmatpush3.bf16.msra.mxu0 %v1721_v12  ;;  %v1770_v12 = vld [vmem:[#allocation14 + $0xa4] ss:$8 sps:$4 sm:$0xff]  }
  0xb5   :  { %540 = vmatpush2.bf16.msra.mxu1 %v1682_v25 }
  0xb6   :  { %541 = vmatprep.subr.bf16.mxu1 %v1687_v26 }
  0xb9   :  { %542 = vmatpush2.bf16.msra.mxu1 %v1685_v27 }
  0xba   :  { %543 = vmatprep.subr.bf16.mxu1 %v1690_v28  ;;  %v1722_v28 = vld [vmem:[#allocation7 + $0x8] sm:$0xff]  }
  0xbd   :  { %544 = vmatpush2.bf16.msra.mxu1 %v1688_v29  ;;  %v2052_v29 = vmov 0.0  }
  0xbe   :  { %545 = vmatprep.subr.bf16.mxu1 %v1693_v30  ;;  %1618 = vmatprep.subr.bf16.mxu0 %v2052_v29  ;;  %v1723_v30 = vld [vmem:[#allocation7] sm:$0xff]  }
  0xc1   :  { %546 = vmatpush2.bf16.msra.mxu1 %v1691_v31  ;;  %v810_v31 = vld [vmem:[%s2486_s11 + $0x10] sm:$0x77] }
  0xc2   :  { %547 = vmatprep.subr.bf16.mxu1 %v1696_v32  ;;  %v1510_v32 = vcombine.high %v810_v31, %v810_v31  ;;  %v1509_v41 = vcombine.low %v810_v31, %v810_v31 }
  0xc4   :  { %v912_v44 = vsel %vm298_vm0, %v1509_v41, 0 }
  0xc5   :  { %548 = vmatpush2.bf16.msra.mxu1 %v1694_v33 }
  0xc6   :  { %549 = vmatprep.subr.bf16.mxu1 %v1699_v34  ;;  %v1484_v34 = vld [vmem:[%s2481_s6] ss:$0 sm:$0xff] }
  0xc9   :  { %550 = vmatpush2.bf16.msra.mxu1 %v1697_v35 }
  0xca   :  { %551 = vmatprep.subr.bf16.mxu1 %v1702_v36 }
  0xcd   :  { %552 = vmatpush2.bf16.msra.mxu1 %v1700_v37 }
  0xce   :  { %553 = vmatprep.subr.bf16.mxu1 %v1705_v38 }
  0xd1   :  { %554 = vmatpush2.bf16.msra.mxu1 %v1703_v39 }
 0x154   :  { %v339_v57 = vpop.f32.mrf.mxu1 }
 0x155   :  { %v340_v58 = vadd.f32 %v339_v57, %v272_v55  ;;  %v1740_v55 = vld [vmem:[#allocation14 + $0x44] ss:$8 sps:$4 sm:$0xff]   ;;  %v1741_v57 = vld [vmem:[#allocation14 + $0x30] ss:$8 sps:$4 sm:$0xff]  }
 0x156   :  { %v341_v59 = vpop.f32.mrf.mxu1 }
 0x157   :  { %v346_v60 = vmul.f32 0.01, %v340_v58  ;;  %v342_v61 = vadd.f32 %v341_v59, %v276_v56  ;;  %v1738_v56 = vld [vmem:[#allocation14 + $0x40] ss:$8 sps:$4 sm:$0xff]  }
 0x158   :  { %v343_v62 = vpop.f32.mrf.mxu1  ;;  %v1744_v59 = vld [vmem:[#allocation14 + $0x20] ss:$8 sps:$4 sm:$0xff]  }
 0x159   :  { %v347_v63 = vmul.f32 0.01, %v342_v61  ;;  %v348_v1 = vmax.f32 %v340_v58, %v346_v60  ;;  %v1746_v58 = vld [vmem:[#allocation14 + $0x24] ss:$8 sps:$4 sm:$0xff]   ;;  %v1747_v60 = vld [vmem:[#allocation14 + $0x10] ss:$8 sps:$4 sm:$0xff]  }
 0x15a   :  { %v344_v2 = vpop.f32.mrf.mxu1  ;;  %v1750_v62 = vld [vmem:[#allocation14] ss:$8 sps:$4 sm:$0xff]  }
 0x15b   :  { %v349_v3 = vmax.f32 %v342_v61, %v347_v63  ;;  %v350_v5 = vpack.c.bf16 %v348_v1, %v348_v1  ;;  %v1752_v61 = vld [vmem:[#allocation14 + $0x4] ss:$8 sps:$4 sm:$0xff]   ;;  %v1755_v63 = vld [vmem:[#allocation14 + $0xf4] ss:$8 sps:$4 sm:$0xff]   ;;  %v1753_v1 = vld [vmem:[#allocation14 + $0xf0] ss:$8 sps:$4 sm:$0xff]  }
 0x15c   :  { %v1758_v2 = vld [vmem:[#allocation14 + $0xe4] ss:$8 sps:$4 sm:$0xff]  }
 0x15d   :  { %v351_v4 = vpack.c.bf16 %v349_v3, %v349_v3  ;;  %v1756_v3 = vld [vmem:[#allocation14 + $0xe0] ss:$8 sps:$4 sm:$0xff]  }
 0x15f   :  { %555 = vmatprep.mubr.bf16.mxu1 %v351_v4  ;;  %v1761_v4 = vld [vmem:[#allocation14 + $0xd4] ss:$8 sps:$4 sm:$0xff]  }
 0x160   :  { %556 = vmatmul.mubr.bf16.vlgmr.msra.gmra.mxu1 %v350_v5  ;;  %v1759_v5 = vld [vmem:[#allocation14 + $0xd0] ss:$8 sps:$4 sm:$0xff]  }
 0x220   :  { %v557_v16 = vpop.f32.mrf.mxu1 }
 0x221   :  { %v558_v17 = vadd.f32 %v557_v16, %v356_v14  ;;  %v1771_v14 = vld [vmem:[#allocation14 + $0x90] ss:$8 sps:$4 sm:$0xff]   ;;  %v1774_v16 = vld [vmem:[#allocation14 + $0x80] ss:$8 sps:$4 sm:$0xff]  }
 0x222   :  { %v559_v18 = vpop.f32.mrf.mxu1 }
 0x223   :  { %v564_v19 = vmul.f32 0.01, %v558_v17  ;;  %v560_v20 = vadd.f32 %v559_v18, %v360_v15  ;;  %v1776_v15 = vld [vmem:[#allocation14 + $0x84] ss:$8 sps:$4 sm:$0xff]  }
 0x224   :  { %v561_v21 = vpop.f32.mrf.mxu1 }
 0x225   :  { %v565_v22 = vmul.f32 0.01, %v560_v20  ;;  %v566_v23 = vmax.f32 %v558_v17, %v564_v19  ;;  %v1501_v17 = vld [vmem:[#allocation8] ss:$0 sm:$0xff]  ;;  %v811_v21 = vld [vmem:[#allocation13] sm:$0x3] }
 0x226   :  { %v562_v24 = vpop.f32.mrf.mxu1 }
 0x227   :  { %v567_v25 = vmax.f32 %v560_v20, %v565_v22  ;;  %v568_v27 = vpack.c.bf16 %v566_v23, %v566_v23 }
 0x229   :  { %v569_v26 = vpack.c.bf16 %v567_v25, %v567_v25  ;;  %v889_v25 = vrot.slane %v811_v21, %v2341_v52 }
 0x22b   :  { %704 = vmatprep.mubr.bf16.mxu0 %v569_v26 }
 0x22c   :  { %705 = vmatmul.mubr.bf16.vlgmr.msra.gmra.mxu0 %v568_v27 }
 0x22d   :  { %1619 = vmatpush3.bf16.msra.mxu0 %v1722_v28  ;;  %1622 = vmatprep.mubr.msk.bf16.mxu0 %vm2053_vm2, %v2052_v29  ;;  %v893_v28 = vrot.slane %v811_v21, %v2343_v54 }
 0x22e   :  { %1620 = vmatprep.subr.bf16.mxu0 %v2052_v29 }
 0x231   :  { %1621 = vmatpush3.bf16.msra.mxu0 %v1723_v30 }
 0x232   :  { %1511 = vmatprep.subr.msk.bf16.mxu0 %vm298_vm0, %v1510_v32 }
 0x2ec   :  { %v1584_v33 = vpop.f32.mrf.mxu0 }
 0x2ee   :  { %v1585_v35 = vpop.f32.mrf.mxu0 }
 0x2ef   :  { %v1586_v36 = vadd.f32 %v1585_v35, %v1584_v33 }
 0x2f0   :  { %v1587_v37 = vpop.f32.mrf.mxu0 }
 0x2f1   :  { %v707_v38 = vadd.f32 %v1586_v36, %v1484_v34 }
 0x2f2   :  { %v1588_v39 = vpop.f32.mrf.mxu0 }
 0x2f3   :  { %v712_v40 = vmul.f32 0.01, %v707_v38 }
 0x2f5   :  { %v713_v42 = vmax.f32 %v707_v38, %v712_v40 }
 0x2f7   :  { %v714_v43 = vpack.c.bf16 %v713_v42, %v713_v42  ;;  %v1777_v42 = vld [vmem:[%s2490_s15 + $0x78] sm:$0xff]  }
 0x2f8   :  { %1593 = vmatprep.subr.bf16.mxu1 %v1777_v42 }
 0x2f9   :  { %1623 = vmatmul.mubr.msk.bf16.vlgmr.msra.gmra.mxu0 %vm733_vm3, %v714_v43  ;;  %v1778_v43 = vld [vmem:[%s2490_s15 + $0x38] sm:$0xff]  }
 0x2fa   :  { %930 = vmatpush1.bf16.msra.mxu0 %v912_v44  ;;  %949 = vmatprep.mubr.bf16.mxu0 %v2051_v0  ;;  %v1743_v0 = vld [vmem:[#allocation14 + $0x34] ss:$8 sps:$4 sm:$0xff]  }
 0x2fb   :  { %931 = vmatprep.subr.bf16.mxu0 %v1728_v45  ;;  %v1779_v44 = vld [vmem:[%s2490_s15 + $0x70] sm:$0xff]   ;;  %1594 = vmatpush3.bf16.msra.mxu1 %v1778_v43 }
 0x2fc   :  { %v1780_v45 = vld [vmem:[%s2490_s15 + $0x30] sm:$0xff]   ;;  %1595 = vmatprep.subr.bf16.mxu1 %v1779_v44 }
 0x2fe   :  { %932 = vmatpush1.bf16.msra.mxu0 %v1726_v46  ;;  %v1781_v46 = vld [vmem:[%s2490_s15 + $0x68] sm:$0xff]  }
 0x2ff   :  { %1135 = vmatprep.subr.bf16.mxu0 %v1731_v47  ;;  %1596 = vmatpush3.bf16.msra.mxu1 %v1780_v45  ;;  %v1782_v47 = vld [vmem:[%s2490_s15 + $0x28] sm:$0xff]  }
 0x300   :  { %1597 = vmatprep.subr.bf16.mxu1 %v1781_v46 }
 0x301   :  { %1512 = vmatmul.mubr.msk.bf16.vlgmr.msra.gmra.mxu0 %vm294_vm1, %v2214_v8  ;;  %v1749_v8 = vld [vmem:[#allocation14 + $0x14] ss:$8 sps:$4 sm:$0xff]  }
 0x302   :  { %1136 = vmatpush1.bf16.msra.mxu0 %v1729_v48  ;;  %v1783_v48 = vld [vmem:[%s2490_s15 + $0x60] sm:$0xff]  }
 0x303   :  { %1137 = vmatprep.subr.bf16.mxu0 %v1734_v49  ;;  %1598 = vmatpush3.bf16.msra.mxu1 %v1782_v47  ;;  %v1784_v49 = vld [vmem:[%s2490_s15 + $0x20] sm:$0xff]  }
 0x304   :  { %1599 = vmatprep.subr.bf16.mxu1 %v1783_v48 }
 0x306   :  { %1138 = vmatpush1.bf16.msra.mxu0 %v1732_v50  ;;  %v1785_v50 = vld [vmem:[%s2490_s15 + $0x58] sm:$0xff]  }
 0x307   :  { %1139 = vmatprep.subr.bf16.mxu0 %v1737_v51  ;;  %1600 = vmatpush3.bf16.msra.mxu1 %v1784_v49  ;;  %v1786_v51 = vld [vmem:[%s2490_s15 + $0x18] sm:$0xff]  }
 0x308   :  { %1601 = vmatprep.subr.bf16.mxu1 %v1785_v50 }
 0x30a   :  { %1140 = vmatpush1.bf16.msra.mxu0 %v1735_v53  ;;  %v1787_v53 = vld [vmem:[%s2490_s15 + $0x50] sm:$0xff]  }
 0x30b   :  { %1141 = vmatprep.subr.bf16.mxu0 %v1740_v55  ;;  %1602 = vmatpush3.bf16.msra.mxu1 %v1786_v51  ;;  %v1788_v55 = vld [vmem:[%s2490_s15 + $0x10] sm:$0xff]  }
 0x30c   :  { %1603 = vmatprep.subr.bf16.mxu1 %v1787_v53 }
 0x30e   :  { %1142 = vmatpush1.bf16.msra.mxu0 %v1738_v56  ;;  %v1789_v56 = vld [vmem:[%s2490_s15 + $0x48] sm:$0xff]  }
 0x30f   :  { %1143 = vmatprep.subr.bf16.mxu0 %v1743_v0  ;;  %1604 = vmatpush3.bf16.msra.mxu1 %v1788_v55  ;;  %v1790_v0 = vld [vmem:[%s2490_s15 + $0x8] sm:$0xff]  }
 0x310   :  { %1605 = vmatprep.subr.bf16.mxu1 %v1789_v56 }
 0x312   :  { %1144 = vmatpush1.bf16.msra.mxu0 %v1741_v57  ;;  %v1791_v57 = vld [vmem:[%s2490_s15 + $0x40] sm:$0xff]  }
 0x313   :  { %1145 = vmatprep.subr.bf16.mxu0 %v1746_v58  ;;  %1606 = vmatpush3.bf16.msra.mxu1 %v1790_v0  ;;  %v1792_v58 = vld [vmem:[%s2490_s15] sm:$0xff]  }
 0x314   :  { %1607 = vmatprep.subr.bf16.mxu1 %v1791_v57  ;;  %v1566_v57 = vld [vmem:[%s2494_s19] ss:$0 sm:$0xff] }
 0x316   :  { %1146 = vmatpush1.bf16.msra.mxu0 %v1744_v59 }
 0x317   :  { %1147 = vmatprep.subr.bf16.mxu0 %v1749_v8  ;;  %1608 = vmatpush3.bf16.msra.mxu1 %v1792_v58 }
 0x318   :  { %1626 = vmatprep.subr.bf16.mxu1 %v2052_v29 }
 0x31a   :  { %1148 = vmatpush1.bf16.msra.mxu0 %v1747_v60 }
 0x31b   :  { %1149 = vmatprep.subr.bf16.mxu0 %v1752_v61 }
 0x31e   :  { %1150 = vmatpush1.bf16.msra.mxu0 %v1750_v62 }
 0x31f   :  { %1151 = vmatprep.subr.bf16.mxu0 %v1755_v63 }
 0x322   :  { %1152 = vmatpush2.bf16.msra.mxu0 %v1753_v1 }
 0x323   :  { %1153 = vmatprep.subr.bf16.mxu0 %v1758_v2 }
 0x326   :  { %1154 = vmatpush2.bf16.msra.mxu0 %v1756_v3 }
 0x327   :  { %1155 = vmatprep.subr.bf16.mxu0 %v1761_v4 }
 0x32a   :  { %1156 = vmatpush2.bf16.msra.mxu0 %v1759_v5  ;;  %v1505_v5 = vld [vmem:[#allocation10] ss:$0 sm:$0xff] }
 0x32b   :  { %1157 = vmatprep.subr.bf16.mxu0 %v1764_v6 }
 0x32e   :  { %1158 = vmatpush2.bf16.msra.mxu0 %v1762_v7  ;;  %v1506_v7 = vld [vmem:[#allocation11] ss:$0 sm:$0xff] }
 0x32f   :  { %1159 = vmatprep.subr.bf16.mxu0 %v1767_v10 }
 0x332   :  { %1160 = vmatpush2.bf16.msra.mxu0 %v1765_v9 }
 0x333   :  { %1161 = vmatprep.subr.bf16.mxu0 %v1770_v12  ;;  %v844_v12 = vld [vmem:[#allocation16] sm:$0x3] }
 0x336   :  { %1162 = vmatpush2.bf16.msra.mxu0 %v1768_v11 }
 0x337   :  { %1163 = vmatprep.subr.bf16.mxu0 %v1773_v13  ;;  %v968_v13 = vrot.slane %v844_v12, %v2341_v52  ;;  %v1793_v52 = vld [vmem:[%s2492_s17 + $0x8] sm:$0xff]  }
 0x33a   :  { %1164 = vmatpush2.bf16.msra.mxu0 %v1771_v14  ;;  %v972_v14 = vrot.slane %v844_v12, %v2343_v54  ;;  %v1794_v54 = vld [vmem:[%s2492_s17] sm:$0xff]  }
 0x33b   :  { %1165 = vmatprep.subr.bf16.mxu0 %v1776_v15 }
 0x33e   :  { %1166 = vmatpush2.bf16.msra.mxu0 %v1774_v16 }
 0x3b9   :  { %v771_v18 = vpop.f32.mrf.mxu0 }
 0x3ba   :  { %v2389_v19 = vadd.f32 %v1501_v17, %v771_v18 }
 0x3bb   :  { %v1624_v20 = vpop.f32.mrf.mxu0 }
 0x3bc   :  { %v777_v22 = vsel %vm733_vm3, %v2389_v19, 0.0  ;;  %v780_v23 = vmul.f32 %v2389_v19, %v2389_v19 }
 0x3bd   :  { %778 = vadd.xlane.f32.xlu1 %v777_v22  ;;  %v774_v24 = vpop.f32.mrf.mxu0 }
 0x3be   :  { %v781_v27 = vsel %vm733_vm3, %v780_v23, 0.0 }
 0x3bf   :  { %v1625_v26 = vpop.f32.mrf.mxu0 }
 0x3c1   :  { %782 = vadd.xlane.f32.xlu1 %v781_v27  ;;  %v951_v30 = vpop.f32.mrf.mxu0 }
 0x3c2   :  { %v952_v31 = vadd.f32 %v951_v30, %v889_v25 }
 0x3c3   :  { %v953_v32 = vpop.f32.mrf.mxu0 }
 0x3c4   :  { %v958_v33 = vmul.f32 0.01, %v952_v31  ;;  %v954_v34 = vadd.f32 %v953_v32, %v893_v28  ;;  %v1545_v28 = vld [vmem:[#allocation17] ss:$0 sm:$0xff] }
 0x3c5   :  { %v955_v35 = vpop.f32.mrf.mxu0 }
 0x3c6   :  { %v959_v36 = vmul.f32 0.01, %v954_v34  ;;  %v960_v37 = vmax.f32 %v952_v31, %v958_v33 }
 0x3c7   :  { %v956_v38 = vpop.f32.mrf.mxu0 }
 0x3c8   :  { %v961_v39 = vmax.f32 %v954_v34, %v959_v36  ;;  %v962_v41 = vpack.c.bf16 %v960_v37, %v960_v37 }
 0x3ca   :  { %v963_v40 = vpack.c.bf16 %v961_v39, %v961_v39 }
 0x3cc   :  { %1167 = vmatprep.mubr.bf16.mxu0 %v963_v40 }
 0x3cd   :  { %1168 = vmatmul.mubr.bf16.vlgmr.msra.gmra.mxu0 %v962_v41 }
 0x446   :  { %v779_v59 = vpop.xlane.xlu1 %778 }
 0x447   :  { %v784_v8 = vmul.f32 0.03125, %v779_v59  ;;  %v1567_v59 = vld [vmem:[%s2495_s20] ss:$0 sm:$0xff] }
 0x449   :  { %v786_v61 = vmul.f32 %v784_v8, %v784_v8  ;;  %v789_v3 = vsub.f32 %v2389_v19, %v784_v8 }
 0x44a   :  { %v783_v60 = vpop.xlane.xlu1 %782 }
 0x44b   :  { %v785_v62 = vmul.f32 0.03125, %v783_v60 }
 0x44d   :  { %v787_v63 = vsub.f32 %v785_v62, %v786_v61 }
 0x44f   :  { %v788_v1 = vmax.f32 %v787_v63, 0.0 }
 0x451   :  { %v790_v2 = vadd.f32 1e-05, %v788_v1 }
 0x453   :  { %1795 = vrsqrt.f32 %v790_v2 }
 0x460   :  { %v1796_v4 = vpop.eup %1795 }
 0x461   :  { %v792_v6 = vmul.f32 %v1796_v4, %v789_v3 }
 0x463   :  { %v799_v9 = vmul.f32 %v1505_v5, %v792_v6 }
 0x465   :  { %v806_v10 = vadd.f32 %v1506_v7, %v799_v9 }
 0x467   :  { %1797 = vtanh.f32 %v806_v10 }
 0x474   :  { %v1798_v11 = vpop.eup %1797 }
 0x475   :  { %1419 = vst.msk [vmem:[#allocation19] sm:$0xff] %vm733_vm3, %v1798_v11 }
 0x48d   :  { %v1169_v15 = vpop.f32.mrf.mxu0 }
 0x48e   :  { %v1170_v16 = vadd.f32 %v1169_v15, %v968_v13 }
 0x48f   :  { %v1171_v17 = vpop.f32.mrf.mxu0 }
 0x490   :  { %v1176_v18 = vmul.f32 0.01, %v1170_v16  ;;  %v1172_v19 = vadd.f32 %v1171_v17, %v972_v14 }
 0x491   :  { %v1173_v20 = vpop.f32.mrf.mxu0 }
 0x492   :  { %v1177_v21 = vmul.f32 0.01, %v1172_v19  ;;  %v1178_v22 = vmax.f32 %v1170_v16, %v1176_v18 }
 0x493   :  { %v1174_v23 = vpop.f32.mrf.mxu0 }
 0x494   :  { %v1179_v24 = vmax.f32 %v1172_v19, %v1177_v21  ;;  %v1180_v26 = vpack.c.bf16 %v1178_v22, %v1178_v22 }
 0x496   :  { %v1181_v25 = vpack.c.bf16 %v1179_v24, %v1179_v24 }
 0x498   :  { %1316 = vmatprep.mubr.bf16.mxu1 %v1181_v25 }
 0x499   :  { %1317 = vmatmul.mubr.bf16.vlgmr.msra.gmra.mxu1 %v1180_v26 }
 0x49a   :  { %1630 = vmatprep.mubr.msk.bf16.mxu1 %vm2053_vm2, %v2052_v29  ;;  %1627 = vmatpush3.bf16.msra.mxu1 %v1793_v52 }
 0x49b   :  { %1628 = vmatprep.subr.bf16.mxu1 %v2052_v29  ;;  %v1562_v29 = vld [vmem:[%s2493_s18] ss:$0 sm:$0xff] }
 0x49e   :  { %1629 = vmatpush3.bf16.msra.mxu1 %v1794_v54 }
 0x559   :  { %v1609_v27 = vpop.f32.mrf.mxu1 }
 0x55b   :  { %v1610_v30 = vpop.f32.mrf.mxu1 }
 0x55c   :  { %v1611_v31 = vadd.f32 %v1610_v30, %v1609_v27 }
 0x55d   :  { %v1612_v32 = vpop.f32.mrf.mxu1 }
 0x55e   :  { %v1319_v33 = vadd.f32 %v1611_v31, %v1545_v28 }
 0x55f   :  { %v1613_v34 = vpop.f32.mrf.mxu1 }
 0x560   :  { %v1324_v35 = vmul.f32 0.01, %v1319_v33 }
 0x562   :  { %v1325_v36 = vmax.f32 %v1319_v33, %v1324_v35 }
 0x564   :  { %v1326_v37 = vpack.c.bf16 %v1325_v36, %v1325_v36 }
 0x566   :  { %1631 = vmatmul.mubr.msk.bf16.vlgmr.msra.gmra.mxu1 %vm733_vm3, %v1326_v37 }
 0x626   :  { %v1382_v38 = vpop.f32.mrf.mxu1 }
 0x627   :  { %v1383_v39 = vadd.f32 %v1562_v29, %v1382_v38 }
 0x628   :  { %v1632_v40 = vpop.f32.mrf.mxu1 }
 0x629   :  { %v1388_v41 = vsel %vm733_vm3, %v1383_v39, 0.0  ;;  %v1391_v42 = vmul.f32 %v1383_v39, %v1383_v39 }
 0x62a   :  { %1389 = vadd.xlane.f32.xlu0 %v1388_v41  ;;  %v1385_v43 = vpop.f32.mrf.mxu1 }
 0x62b   :  { %v1392_v45 = vsel %vm733_vm3, %v1391_v42, 0.0 }
 0x62c   :  { %v1633_v44 = vpop.f32.mrf.mxu1 }
 0x62e   :  { %1393 = vadd.xlane.f32.xlu0 %v1392_v45 }
 0x6b3   :  { %v1390_v46 = vpop.xlane.xlu0 %1389 }
 0x6b4   :  { %v1395_v47 = vmul.f32 0.03125, %v1390_v46 }
 0x6b6   :  { %v1397_v49 = vmul.f32 %v1395_v47, %v1395_v47  ;;  %v1400_v56 = vsub.f32 %v1383_v39, %v1395_v47 }
 0x6b7   :  { %v1394_v48 = vpop.xlane.xlu0 %1393 }
 0x6b8   :  { %v1396_v50 = vmul.f32 0.03125, %v1394_v48 }
 0x6ba   :  { %v1398_v51 = vsub.f32 %v1396_v50, %v1397_v49 }
 0x6bc   :  { %v1399_v53 = vmax.f32 %v1398_v51, 0.0 }
 0x6be   :  { %v1401_v55 = vadd.f32 1e-05, %v1399_v53 }
 0x6c0   :  { %1799 = vrsqrt.f32 %v1401_v55 }
 0x6cd   :  { %v1800_v0 = vpop.eup %1799 }
 0x6ce   :  { %v1403_v58 = vmul.f32 %v1800_v0, %v1400_v56 }
 0x6d0   :  { %v1410_v8 = vmul.f32 %v1566_v57, %v1403_v58 }
 0x6d2   :  { %v1417_v60 = vadd.f32 %v1567_v59, %v1410_v8 }
 0x6d4   :  { %1801 = vtanh.f32 %v1417_v60 }
 0x6e1   :  { %v1802_v61 = vpop.eup %1801 }
 0x6e2   :  { %1421 = vrot.lane.b32.xlu0 %v1802_v61, %s2054_s9 }
 0x754   :  { %v1422_v62 = vpop.permute.xlu0 %1421 }
 0x755   :  { %1425 = vst.msk [vmem:[#allocation19] sm:$0xff] %vm1424_vm4, %v1422_v62 }
 0x756   :  { %2014 = shalt.err (!%p2011_p12)
}
 0x757   :  { %1435 = dma.vmem_to_hbm [thread:$0]  %s1433_s2, 128, %s2496_s21, [#allocation4]  }
 0x758   :  { %2035 = dma.done.wait [#allocation4], 128  }
 0x759   :  { %2036 = vsyncadd [#allocation4], 4294967168 }
 0x75a   :  { %1439 = vsyncpa [#allocation3], 1 }
 0x75b   :  { %1440 = vsyncpa [#allocation6], 1 }
 0x75c   :  { %1441 = vsyncpa [#allocation9], 1 }
 0x75d   :  { %1442 = vsyncpa [#allocation12], 1 }
 0x75e   :  { %1443 = vsyncpa [#allocation15], 1 }
 0x75f   :  { %1444 = vsyncpa [#allocation18], 1 }
 0x760   :  { %1445 = vsyncpa [#allocation4], 1 }

</bundles_post_ra>
